<compile_context>
chip_gen: v7x
topology: tpu7x:2x2x1
jax: 0.10.0
libtpu: 0.0.40
codegen_flags: <defaults>
</compile_context>

<pallas_src>
import jax
import jax.numpy as jnp
from jax.experimental import pallas as pl
from jax.experimental.pallas import tpu as pltpu

# Pendulum-v1: observation dim = 3
STATE_DIM = 3
HIDDEN_DIM = 128
ACTION_DIM = 21
PAD_N = 128                        # lane-dense width for W2 / output
W1_ROWS = 8                        # rows 0-2 = W1, 3 = b1, 4 = b2 (padded), 5-7 = zero
PARAM_ROWS = W1_ROWS + HIDDEN_DIM  # 136 rows total: rows 8..135 = W2 (sublane aligned)


def _round_up(n, m):
    return ((n + m - 1) // m) * m


def qnet_kernel(x_ref, p_ref, o_ref):
    # p_ref rows: 0..2 = W1, 3 = b1, 4 = b2 (zero-padded), 5..7 = zeros, 8..135 = W2.
    x = x_ref[...]                                   # (TB, STATE_DIM)

    # ---- fc1 + ReLU on the VPU (K=3 contraction: 3 broadcast FMAs, no MXU pass) ----
    h = p_ref[3:4, :]                                # b1, broadcasts over batch
    h = h + x[:, 0:1] * p_ref[0:1, :]
    h = h + x[:, 1:2] * p_ref[1:2, :]
    h = h + x[:, 2:3] * p_ref[2:3, :]
    h = jnp.maximum(h, 0.0)                          # (TB, HIDDEN_DIM)

    # ---- fc2 on the MXU: lane-dense (TB,128) @ (128,128), f32 accumulation ----
    w2 = p_ref[W1_ROWS:PARAM_ROWS, :]                # static, 8-aligned slice -> view
    y = jnp.dot(h, w2, preferred_element_type=jnp.float32)
    o_ref[...] = (y + p_ref[4:5, :]).astype(o_ref.dtype)   # + b2 (padded row)


def pack_params(w1, b1, w2, b2):
    """Host-side, done once: pack W1/b1/b2/W2 into a single (136, 128) slab."""
    p = jnp.zeros((PARAM_ROWS, PAD_N), jnp.float32)
    p = p.at[0:STATE_DIM, 0:HIDDEN_DIM].set(w1)
    p = p.at[3, 0:HIDDEN_DIM].set(b1.reshape(-1))
    p = p.at[4, 0:ACTION_DIM].set(b2.reshape(-1))
    p = p.at[W1_ROWS:W1_ROWS + HIDDEN_DIM, 0:ACTION_DIM].set(w2)
    return p


def qnet_forward(x, params, *, max_tile=512):
    batch = x.shape[0]
    b8 = _round_up(batch, 8)
    n_tiles = max(1, -(-b8 // max_tile))            # ceil-div
    tile = _round_up(-(-b8 // n_tiles), 8)          # minimize padding, keep %8 == 0
    b_pad = tile * n_tiles
    if b_pad != batch:
        x = jnp.pad(x, ((0, b_pad - batch), (0, 0)))

    out = pl.pallas_call(
        qnet_kernel,
        out_shape=jax.ShapeDtypeStruct((b_pad, PAD_N), jnp.float32),
        grid=(n_tiles,),
        in_specs=[
            pl.BlockSpec((tile, STATE_DIM), lambda i: (i, 0)),      # x: batch-tiled
            pl.BlockSpec((PARAM_ROWS, PAD_N), lambda i: (0, 0)),    # packed params: resident
        ],
        out_specs=pl.BlockSpec((tile, PAD_N), lambda i: (i, 0)),
        compiler_params=pltpu.CompilerParams(
            dimension_semantics=("parallel",)),
    )(x, params)

    # Free layout plumbing: drop batch padding and the 21->128 lane padding outside.
    return out[:batch, :ACTION_DIM]


def init_params(key):
    """Deterministic init mimicking PyTorch Linear default (U[-1/sqrt(fan_in), +])."""
    k1, k2, k3, k4 = jax.random.split(key, 4)
    bound1 = 1.0 / jnp.sqrt(STATE_DIM)
    bound2 = 1.0 / jnp.sqrt(HIDDEN_DIM)
    w1 = jax.random.uniform(k1, (STATE_DIM, HIDDEN_DIM), jnp.float32, -bound1, bound1)
    b1 = jax.random.uniform(k2, (HIDDEN_DIM,), jnp.float32, -bound1, bound1)
    w2 = jax.random.uniform(k3, (HIDDEN_DIM, ACTION_DIM), jnp.float32, -bound2, bound2)
    b2 = jax.random.uniform(k4, (ACTION_DIM,), jnp.float32, -bound2, bound2)
    return w1, b1, w2, b2


def _ref(x, w1, b1, w2, b2):
    return jnp.maximum(x @ w1 + b1, 0.0) @ w2 + b2


if __name__ == "__main__":
    key = jax.random.PRNGKey(0)
    kx, kp = jax.random.split(key)

    w1, b1, w2, b2 = init_params(kp)
    params = pack_params(w1, b1, w2, b2)

    # Small batch (single tile).
    batch = 8
    x = jax.random.normal(kx, (batch, STATE_DIM), jnp.float32)
    out = qnet_forward(x, params)
    jax.block_until_ready(out)
    ref = _ref(x, w1, b1, w2, b2)
    assert out.shape == (batch, ACTION_DIM)
    assert jnp.allclose(out, ref, atol=1e-5, rtol=1e-5)

    # Batch that exercises batch padding (not a multiple of 8).
    xb = jax.random.normal(jax.random.PRNGKey(1), (300, STATE_DIM), jnp.float32)
    out_b = qnet_forward(xb, params)
    jax.block_until_ready(out_b)
    ref_b = _ref(xb, w1, b1, w2, b2)
    assert out_b.shape == (300, ACTION_DIM)
    assert jnp.allclose(out_b, ref_b, atol=1e-5, rtol=1e-5)

    # Batch that exercises a multi-tile grid (2 tiles of 304 rows).
    xc = jax.random.normal(jax.random.PRNGKey(2), (600, STATE_DIM), jnp.float32)
    out_c = qnet_forward(xc, params)
    jax.block_until_ready(out_c)
    ref_c = _ref(xc, w1, b1, w2, b2)
    assert out_c.shape == (600, ACTION_DIM)
    assert jnp.allclose(out_c, ref_c, atol=1e-5, rtol=1e-5)

    print("KERNEL_OK")
</pallas_src>

<mosaic_0001>
module attributes {stable_mosaic.version = 11 : i64} {
  func.func @qnet_kernel(%arg0: i32, %arg1: memref<8x3xf32, #tpu.memory_space<vmem>>, %arg2: memref<136x128xf32, #tpu.memory_space<vmem>>, %arg3: memref<8x128xf32, #tpu.memory_space<vmem>>) attributes {dimension_semantics = [#tpu.dimension_semantics<parallel>], iteration_bounds = array<i64: 1>, scalar_prefetch = 0 : i64, scratch_operands = 0 : i64, tpu.core_type = #tpu.core_type<tc>, window_params = [{transform_indices = @transform_0, window_bounds = array<i64: 8, 3>}, {pipeline_mode = #tpu.pipeline_mode<synchronous>, transform_indices = @transform_1, window_bounds = array<i64: 136, 128>}, {transform_indices = @transform_2, window_bounds = array<i64: 8, 128>}]} {
    %c0 = arith.constant 0 : index
    %c0_0 = arith.constant 0 : index
    %0 = vector.load %arg1[%c0, %c0_0] : memref<8x3xf32, #tpu.memory_space<vmem>>, vector<8x3xf32>
    %c3 = arith.constant 3 : index
    %c0_1 = arith.constant 0 : index
    %1 = vector.load %arg2[%c3, %c0_1] : memref<136x128xf32, #tpu.memory_space<vmem>>, vector<1x128xf32>
    %2 = vector.extract_strided_slice %0 {offsets = [0, 0], sizes = [8, 1], strides = [1, 1]} : vector<8x3xf32> to vector<8x1xf32>
    %c0_2 = arith.constant 0 : index
    %c0_3 = arith.constant 0 : index
    %3 = vector.load %arg2[%c0_2, %c0_3] : memref<136x128xf32, #tpu.memory_space<vmem>>, vector<1x128xf32>
    %4 = vector.broadcast %2 : vector<8x1xf32> to vector<8x128xf32>
    %5 = vector.broadcast %3 : vector<1x128xf32> to vector<8x128xf32>
    %6 = arith.mulf %4, %5 : vector<8x128xf32>
    %7 = vector.broadcast %1 : vector<1x128xf32> to vector<8x128xf32>
    %8 = arith.addf %7, %6 : vector<8x128xf32>
    %9 = vector.extract_strided_slice %0 {offsets = [0, 1], sizes = [8, 1], strides = [1, 1]} : vector<8x3xf32> to vector<8x1xf32>
    %c1 = arith.constant 1 : index
    %c0_4 = arith.constant 0 : index
    %10 = vector.load %arg2[%c1, %c0_4] : memref<136x128xf32, #tpu.memory_space<vmem>>, vector<1x128xf32>
    %11 = vector.broadcast %9 : vector<8x1xf32> to vector<8x128xf32>
    %12 = vector.broadcast %10 : vector<1x128xf32> to vector<8x128xf32>
    %13 = arith.mulf %11, %12 : vector<8x128xf32>
    %14 = arith.addf %8, %13 : vector<8x128xf32>
    %15 = vector.extract_strided_slice %0 {offsets = [0, 2], sizes = [8, 1], strides = [1, 1]} : vector<8x3xf32> to vector<8x1xf32>
    %c2 = arith.constant 2 : index
    %c0_5 = arith.constant 0 : index
    %16 = vector.load %arg2[%c2, %c0_5] : memref<136x128xf32, #tpu.memory_space<vmem>>, vector<1x128xf32>
    %17 = vector.broadcast %15 : vector<8x1xf32> to vector<8x128xf32>
    %18 = vector.broadcast %16 : vector<1x128xf32> to vector<8x128xf32>
    %19 = arith.mulf %17, %18 : vector<8x128xf32>
    %20 = arith.addf %14, %19 : vector<8x128xf32>
    %cst = arith.constant 0.000000e+00 : f32
    %21 = vector.broadcast %cst : f32 to vector<8x128xf32>
    %22 = arith.maximumf %20, %21 : vector<8x128xf32>
    %c8 = arith.constant 8 : index
    %c0_6 = arith.constant 0 : index
    %23 = vector.load %arg2[%c8, %c0_6] : memref<136x128xf32, #tpu.memory_space<vmem>>, vector<128x128xf32>
    %cst_7 = arith.constant dense<0.000000e+00> : vector<8x128xf32>
    %24 = tpu.matmul %22, %23, %cst_7 {dimension_numbers = #tpu.dot_dimension_numbers<[1], [0], [0], [1], [0, 0, 1, 1], [], []>} : vector<8x128xf32>, vector<128x128xf32>, vector<8x128xf32> -> vector<8x128xf32>
    %c4 = arith.constant 4 : index
    %c0_8 = arith.constant 0 : index
    %25 = vector.load %arg2[%c4, %c0_8] : memref<136x128xf32, #tpu.memory_space<vmem>>, vector<1x128xf32>
    %26 = vector.broadcast %25 : vector<1x128xf32> to vector<8x128xf32>
    %27 = arith.addf %24, %26 : vector<8x128xf32>
    %c0_9 = arith.constant 0 : index
    %c0_10 = arith.constant 0 : index
    %28 = vector.load %arg3[%c0_9, %c0_10] : memref<8x128xf32, #tpu.memory_space<vmem>>, vector<8x128xf32>
    tpu.vector_store %arg3[%c0_9, %c0_10], %27 {strides = array<i32>} : memref<8x128xf32, #tpu.memory_space<vmem>>, vector<8x128xf32>,
    return
  }
  func.func @transform_0(%arg0: i32) -> (i32, i32) {
    %c0_i32 = arith.constant 0 : i32
    %c0_i32_0 = arith.constant 0 : i32
    return %arg0, %c0_i32 : i32, i32
  }
  func.func @transform_1(%arg0: i32) -> (i32, i32) {
    %c0_i32 = arith.constant 0 : i32
    %c0_i32_0 = arith.constant 0 : i32
    %c0_i32_1 = arith.constant 0 : i32
    return %c0_i32, %c0_i32_0 : i32, i32
  }
  func.func @transform_2(%arg0: i32) -> (i32, i32) {
    %c0_i32 = arith.constant 0 : i32
    %c0_i32_0 = arith.constant 0 : i32
    return %arg0, %c0_i32 : i32, i32
  }
}

</mosaic_0001>

<bundles_post_ra>
// kernel: tpu_custom_call.1
= control target key start
LH: loop header
LB: loop body
LE: loop exit
PB: predicated region body
PF: predicated region fallthrough
CT: control target
= control target key end

     0   :  { %7 = vsyncpa [#allocation3], 0  ;;  %s369_s0 = inlined_call_operand.vmem [shape: f32[8,3], index: 0, kind: input, shape index: {}]   ;;  %s370_s1 = inlined_call_operand.hbm [shape: f32[136,128], index: 1, kind: input, shape index: {}]   ;;  %s371_s2 = inlined_call_operand.hbm [shape: f32[8,128], index: 2, kind: output, shape index: {}]  }
   0x1   :  { %8 = vsyncpa [#allocation4], 0  ;;  %s317_s9 = smov [#allocation2]   ;;  %s269_s13 = scalar_lea.hbm %s370_s1, 2176 }
   0x2   :  { %s16_s10 = sshll.u32 %s317_s9, 4  ;;  %p270_p0 = scmp.ne.s32.totalorder %s370_s1, %s269_s13  ;;  %s17_s10 = int_to_ptr.vmem [resolvable:$true] %s16_s10 }
   0x3   :  { %p273_p1 = scmp.lt.u32.totalorder %s269_s13, %s370_s1 }
   0x5   :  { %p275_p2 = pnand %p273_p1, %p270_p0 }
   0x7   :  { %278 = shalt.err (!%p275_p2)
}
   0x8   :  { %s279_s18 = scalar_lea.vmem %s17_s10, 2176  ;;  %p284_p4 = scmp.lt.s32.totalorder %s17_s10, %s17_s10 }
   0x9   :  { %p280_p3 = scmp.ne.s32.totalorder %s17_s10, %s279_s18  ;;  %p285_p5 = scmp.lt.s32.totalorder %s279_s18, %s279_s18 }
   0xb   :  { %p286_p6 = por %p285_p5, %p284_p4 }
   0xd   :  { %p287_p7 = pnand %p286_p6, %p280_p3 }
   0xf   :  { %290 = shalt.err (!%p287_p7)
}
  0x10   :  { %s318_s19 = smov 128   ;;  %s319_s20 = smov 8  }
  0x11   :  { %22 = dma.hbm_to_vmem [thread:$0]  %s370_s1, 2176, %s17_s10, [#allocation3], %s318_s19, %s318_s19, %s319_s20  }
  0x12   :  { %313 = dma.done.wait [#allocation3], 2176  }
  0x13   :  { %314 = vsyncadd [#allocation3], 4294965120  ;;  %v320_v0 = vmov 0   ;;  %v321_v1 = vmov 2   ;;  %v322_v2 = vmov 0.0|0.0   ;;  %v26_v3 = vld [vmem:[%s369_s0] sm:$0xff] }
  0x14   :  { %265 = vset.pattern.permute.xlu0 %v320_v0  ;;  %267 = vset.pattern.permute.xlu1 %v321_v1  ;;  %v67_v4 = vld [vmem:[#allocation2 + $0x8] sm:$0xff]  ;;  %v68_v5 = vld [vmem:[#allocation2 + $0x10] sm:$0xff]  ;;  %v69_v7 = vld [vmem:[#allocation2 + $0x18] sm:$0xff]  ;;  %v323_v12 = vmov 1   ;;  %vm324_vm0 = vmmov 0   ;;  %v325_v19 = vmov 0.0  }
  0x15   :  { %231 = vmatprep.subr.bf16.mxu0 %v322_v2  ;;  %31 = vperm.xlu0 %265, %v26_v3   ;;  %v232_v6 = vpack.c.bf16 %v68_v5, %v67_v4  ;;  %v70_v8 = vld [vmem:[#allocation2 + $0x20] sm:$0xff]  ;;  %v71_v10 = vld [vmem:[#allocation2 + $0x28] sm:$0xff]  ;;  %v72_v11 = vld [vmem:[#allocation2 + $0x30] sm:$0xff]  ;;  %s326_s0 = smov [#allocation5]  }
  0x16   :  { %57 = vperm.xlu1 %267, %v26_v3   ;;  %v235_v9 = vpack.c.bf16 %v70_v8, %v69_v7  ;;  %v238_v13 = vpack.c.bf16 %v72_v11, %v71_v10  ;;  %v73_v14 = vld [vmem:[#allocation2 + $0x38] sm:$0xff]  ;;  %v74_v15 = vld [vmem:[#allocation2 + $0x40] sm:$0xff]  ;;  %v75_v17 = vld [vmem:[#allocation2 + $0x48] sm:$0xff]  ;;  %228 = vmatprep.mubr.msk.f32.mxu0 %vm324_vm0, %v325_v19  ;;  %s165_s1 = sshll.u32 %s326_s0, 4  ;;  %s166_s1 = int_to_ptr.vmem [resolvable:$true] %s165_s1 }
  0x17   :  { %233 = vmatpush3.bf16.msra.mxu0 %v232_v6  ;;  %v241_v16 = vpack.c.bf16 %v74_v15, %v73_v14  ;;  %v76_v18 = vld [vmem:[#allocation2 + $0x50] sm:$0xff]  ;;  %v77_v21 = vld [vmem:[#allocation2 + $0x58] sm:$0xff]  ;;  %v78_v22 = vld [vmem:[#allocation2 + $0x60] sm:$0xff]  ;;  %s291_s25 = scalar_lea.vmem %s166_s1, 128  ;;  %p296_p9 = scmp.lt.s32.totalorder %s166_s1, %s166_s1 }
  0x18   :  { %234 = vmatprep.subr.bf16.mxu0 %v322_v2  ;;  %v244_v20 = vpack.c.bf16 %v76_v18, %v75_v17  ;;  %v247_v23 = vpack.c.bf16 %v78_v22, %v77_v21  ;;  %v79_v24 = vld [vmem:[#allocation2 + $0x68] sm:$0xff]  ;;  %v80_v25 = vld [vmem:[#allocation2 + $0x70] sm:$0xff]  ;;  %v81_v27 = vld [vmem:[#allocation2 + $0x78] sm:$0xff]  ;;  %p292_p8 = scmp.ne.s32.totalorder %s166_s1, %s291_s25  ;;  %p297_p10 = scmp.lt.s32.totalorder %s291_s25, %s291_s25 }
  0x19   :  { %266 = vset.pattern.permute.xlu0 %v323_v12  ;;  %v250_v26 = vpack.c.bf16 %v80_v25, %v79_v24  ;;  %v82_v28 = vld [vmem:[#allocation2 + $0x80] sm:$0xff] }
  0x1a   :  { %46 = vperm.xlu0 %266, %v26_v3   ;;  %v253_v29 = vpack.c.bf16 %v82_v28, %v81_v27  ;;  %v174_v30 = vld [vmem:[#allocation2] ss:$0 sm:$0xff]  ;;  %v175_v33 = vld [vmem:[#allocation2 + $0x3] ss:$0 sm:$0xff]  ;;  %v176_v34 = vld [vmem:[#allocation2 + $0x1] ss:$0 sm:$0xff]  ;;  %p298_p11 = por %p297_p10, %p296_p9 }
  0x1b   :  { %236 = vmatpush3.bf16.msra.mxu0 %v235_v9  ;;  %v177_v35 = vld [vmem:[#allocation2 + $0x2] ss:$0 sm:$0xff]  ;;  %v178_v44 = vld [vmem:[#allocation2 + $0x4] ss:$0 sm:$0xff] }
  0x1c   :  { %237 = vmatprep.subr.bf16.mxu0 %v322_v2  ;;  %p299_p12 = pnand %p298_p11, %p292_p8 }
  0x1e   :  { %268 = vset.pattern.permute.xlu0 %v321_v1 }
  0x1f   :  { %239 = vmatpush3.bf16.msra.mxu0 %v238_v13 }
  0x20   :  { %240 = vmatprep.subr.bf16.mxu0 %v322_v2 }
  0x23   :  { %242 = vmatpush3.bf16.msra.mxu0 %v241_v16 }
  0x24   :  { %243 = vmatprep.subr.bf16.mxu0 %v322_v2 }
  0x27   :  { %245 = vmatpush3.bf16.msra.mxu0 %v244_v20 }
  0x28   :  { %246 = vmatprep.subr.bf16.mxu0 %v322_v2 }
  0x2b   :  { %248 = vmatpush3.bf16.msra.mxu0 %v247_v23 }
  0x2c   :  { %249 = vmatprep.subr.bf16.mxu0 %v322_v2 }
  0x2f   :  { %251 = vmatpush3.bf16.msra.mxu0 %v250_v26 }
  0x30   :  { %252 = vmatprep.subr.bf16.mxu0 %v322_v2 }
  0x33   :  { %254 = vmatpush3.bf16.msra.mxu0 %v253_v29 }
  0x94   :  { %v32_v31 = vpop.permute.xlu0 %31 }
  0x95   :  { %v38_v32 = vmul.f32 %v174_v30, %v32_v31  ;;  %v58_v36 = vpop.permute.xlu1 %57 }
  0x96   :  { %v64_v40 = vmul.f32 %v177_v35, %v58_v36 }
  0x97   :  { %v43_v38 = vadd.f32 %v175_v33, %v38_v32 }
  0x99   :  { %v47_v37 = vpop.permute.xlu0 %46 }
  0x9a   :  { %v53_v39 = vmul.f32 %v176_v34, %v47_v37 }
  0x9c   :  { %v54_v41 = vadd.f32 %v53_v39, %v43_v38 }
  0x9e   :  { %v65_v42 = vadd.f32 %v64_v40, %v54_v41 }
  0xa0   :  { %v66_v43 = vmax.f32 %v65_v42, 0.0 }
  0xa2   :  { %229 = vmatmul.mubr.f32.vlgmr.msra.gmra.mrb[0].mxu0 %v66_v43 }
 0x175   :  { %v154_v45 = vpop.f32.mrb[0].mxu0 }
 0x176   :  { %v155_v46 = vadd.f32 %v178_v44, %v154_v45  ;;  %v230_v47 = vpop.f32.mrb[1].mxu0 }
 0x178   :  { %158 = vst [vmem:[#allocation5] sm:$0xff] %v155_v46 }
 0x179   :  { %302 = shalt.err (!%p299_p12)
}
 0x17a   :  { %s303_s28 = scalar_lea.hbm %s371_s2, 128 }
 0x17b   :  { %p304_p13 = scmp.ne.s32.totalorder %s371_s2, %s303_s28  ;;  %p307_p0 = scmp.lt.u32.totalorder %s303_s28, %s371_s2 }
 0x17d   :  { %p309_p1 = pnand %p307_p0, %p304_p13 }
 0x17f   :  { %312 = shalt.err (!%p309_p1)
}
 0x180   :  { %168 = dma.vmem_to_hbm [thread:$0]  %s166_s1, 128, %s371_s2, [#allocation4]  }
 0x181   :  { %315 = dma.done.wait [#allocation4], 128  }
 0x182   :  { %316 = vsyncadd [#allocation4], 4294967168 }
 0x183   :  { %172 = vsyncpa [#allocation3], 1 }
 0x184   :  { %173 = vsyncpa [#allocation4], 1 }

</bundles_post_ra>
